<compile_context>
chip_gen: v7x
topology: tpu7x:2x2x1
jax: 0.10.0
libtpu: 0.0.40
codegen_flags: <defaults>
</compile_context>

<pallas_src>
import functools

import jax
import jax.numpy as jnp
from jax.experimental import pallas as pl
from jax.experimental.pallas import tpu as pltpu


def mlp_kernel(x_ref, w1_ref, b1_ref, w2_ref, b2_ref, out_ref, hid_ref):
    # In-kernel bf16 cast of x (no wrapper HBM pass); MXU contracts the PyTorch
    # (out_features, in_features) weight layout natively via dot_general.
    x_bf = x_ref[...].astype(jnp.bfloat16)
    h = jax.lax.dot_general(
        x_bf, w1_ref[...],
        dimension_numbers=(((1,), (1,)), ((), ())),
        preferred_element_type=jnp.float32,
    )
    h = jnp.tanh(h + b1_ref[...])            # f32 bias + tanh (EUP slot)
    hid_ref[...] = h                         # mirrors self.hidden_outputs (f32)
    o = jax.lax.dot_general(
        h.astype(jnp.bfloat16), w2_ref[...],
        dimension_numbers=(((1,), (1,)), ((), ())),
        preferred_element_type=jnp.float32,
    )
    out_ref[...] = jnp.tanh(o + b2_ref[...])


def _round_up(x, m):
    return (x + m - 1) // m * m


def prepare_params(w1, b1, w2, b2):
    """One-time parameter prep (off the per-call path): bf16 weights, 2-D f32 biases."""
    return (
        w1.astype(jnp.bfloat16),
        b1.reshape(1, -1).astype(jnp.float32),
        w2.astype(jnp.bfloat16),
        b2.reshape(1, -1).astype(jnp.float32),
    )


@functools.partial(jax.jit, static_argnames=("batch_tile",))
def net_forward(x, w1_bf, b1_2d, w2_bf, b2_2d, *, batch_tile=2048):
    """fc1 -> tanh -> fc2 -> tanh in a single batch-tiled Pallas kernel.

    Args:
      x:     (B, input_size) f32 (unpadded)
      w1_bf: (hidden_size, input_size) bf16   (PyTorch nn.Linear layout)
      b1_2d: (1, hidden_size) f32
      w2_bf: (num_classes, hidden_size) bf16
      b2_2d: (1, num_classes) f32
    Returns:
      out:    (B, num_classes) f32
      hidden: (B, hidden_size) f32   (the `self.hidden_outputs` activations)
    """
    B, in_dim = x.shape
    hidden = w1_bf.shape[0]
    n_cls = w2_bf.shape[0]

    # Batch tile: multiple of 8 (sublane constraint), capped so >= 2 grid tiles
    # whenever B is large enough (v7x megacore), and bounded by batch_tile
    # (VMEM: double-buffered activation blocks stay well under v5e's 16 MiB
    # scoped default at these feature sizes).
    half = -(-B // 2)
    tb = _round_up(min(batch_tile, max(half, 8)), 8)
    grid = (pl.cdiv(B, tb),)

    # NOTE(v6e/v7x): if input/hidden sizes grow >= 256, round the contraction
    # dims to multiples of 256 to fill the 2x256^2 MXU; irrelevant while
    # memory-bound at these dims.
    out, hid = pl.pallas_call(
        mlp_kernel,
        out_shape=(
            jax.ShapeDtypeStruct((B, n_cls), jnp.float32),
            jax.ShapeDtypeStruct((B, hidden), jnp.float32),
        ),
        grid_spec=pl.GridSpec(
            grid=grid,
            in_specs=[
                # batch-tiled activations (lane dim = full array dim -> legal)
                pl.BlockSpec((tb, in_dim), lambda i: (i, 0)),
                # weights / biases: same block every step -> stay resident in VMEM
                pl.BlockSpec((hidden, in_dim), lambda i: (0, 0)),
                pl.BlockSpec((1, hidden), lambda i: (0, 0)),
                pl.BlockSpec((n_cls, hidden), lambda i: (0, 0)),
                pl.BlockSpec((1, n_cls), lambda i: (0, 0)),
            ],
            out_specs=(
                pl.BlockSpec((tb, n_cls), lambda i: (i, 0)),
                pl.BlockSpec((tb, hidden), lambda i: (i, 0)),
            ),
        ),
        compiler_params=pltpu.CompilerParams(
            dimension_semantics=("parallel",),
        ),
    )(x, w1_bf, b1_2d, w2_bf, b2_2d)

    return out, hid


def init_linear(key, out_features, in_features):
    """Deterministic init matching PyTorch nn.Linear default (uniform +-1/sqrt(fan_in))."""
    kw, kb = jax.random.split(key)
    bound = 1.0 / jnp.sqrt(jnp.float32(in_features))
    w = jax.random.uniform(kw, (out_features, in_features), jnp.float32, -bound, bound)
    b = jax.random.uniform(kb, (out_features,), jnp.float32, -bound, bound)
    return w, b


if __name__ == "__main__":
    # Small shapes implied by the module: Net(input_size, hidden_size, num_classes=2, tanh)
    B, input_size, hidden_size, num_classes = 8, 16, 32, 2

    key = jax.random.PRNGKey(0)
    kx, k1, k2 = jax.random.split(key, 3)

    x = jax.random.normal(kx, (B, input_size), jnp.float32)
    w1, b1 = init_linear(k1, hidden_size, input_size)
    w2, b2 = init_linear(k2, num_classes, hidden_size)

    params = prepare_params(w1, b1, w2, b2)       # one-time bf16 cast / reshape
    out, hid = net_forward(x, *params)
    out = jax.block_until_ready(out)
    hid = jax.block_until_ready(hid)

    # Reference in plain JAX (same math as the PyTorch forward), f32 throughout.
    ref_h = jnp.tanh(x @ w1.T + b1)
    ref_o = jnp.tanh(ref_h @ w2.T + b2)
    assert out.shape == (B, num_classes) and hid.shape == (B, hidden_size)
    # bf16 MXU operands with f32 accumulation -> relaxed tolerance.
    assert jnp.allclose(out, ref_o, atol=5e-2), "output mismatch"
    assert jnp.allclose(hid, ref_h, atol=5e-2), "hidden mismatch"

    print("KERNEL_OK")
</pallas_src>

<mosaic_0001>
module attributes {stable_mosaic.version = 11 : i64} {
  func.func @mlp_kernel(%arg0: i32, %arg1: memref<8x16xf32, #tpu.memory_space<vmem>>, %arg2: memref<32x16xbf16, #tpu.memory_space<vmem>>, %arg3: memref<1x32xf32, #tpu.memory_space<vmem>>, %arg4: memref<2x32xbf16, #tpu.memory_space<vmem>>, %arg5: memref<1x2xf32, #tpu.memory_space<vmem>>, %arg6: memref<8x2xf32, #tpu.memory_space<vmem>>, %arg7: memref<8x32xf32, #tpu.memory_space<vmem>>) attributes {dimension_semantics = [#tpu.dimension_semantics<parallel>], iteration_bounds = array<i64: 1>, scalar_prefetch = 0 : i64, scratch_operands = 0 : i64, tpu.core_type = #tpu.core_type<tc>, window_params = [{transform_indices = @transform_0, window_bounds = array<i64: 8, 16>}, {pipeline_mode = #tpu.pipeline_mode<synchronous>, transform_indices = @transform_1, window_bounds = array<i64: 32, 16>}, {pipeline_mode = #tpu.pipeline_mode<synchronous>, transform_indices = @transform_2, window_bounds = array<i64: 1, 32>}, {pipeline_mode = #tpu.pipeline_mode<synchronous>, transform_indices = @transform_3, window_bounds = array<i64: 2, 32>}, {pipeline_mode = #tpu.pipeline_mode<synchronous>, transform_indices = @transform_4, window_bounds = array<i64: 1, 2>}, {transform_indices = @transform_5, window_bounds = array<i64: 8, 2>}, {transform_indices = @transform_6, window_bounds = array<i64: 8, 32>}]} {
    %c0 = arith.constant 0 : index
    %c0_0 = arith.constant 0 : index
    %0 = vector.load %arg1[%c0, %c0_0] : memref<8x16xf32, #tpu.memory_space<vmem>>, vector<8x16xf32>
    %1 = arith.truncf %0 : vector<8x16xf32> to vector<8x16xbf16>
    %c0_1 = arith.constant 0 : index
    %c0_2 = arith.constant 0 : index
    %2 = vector.load %arg2[%c0_1, %c0_2] : memref<32x16xbf16, #tpu.memory_space<vmem>>, vector<32x16xbf16>
    %cst = arith.constant dense<0.000000e+00> : vector<8x32xf32>
    %3 = tpu.matmul %1, %2, %cst {dimension_numbers = #tpu.dot_dimension_numbers<[1], [1], [0], [0], [0, 0, 1, 0], [], []>} : vector<8x16xbf16>, vector<32x16xbf16>, vector<8x32xf32> -> vector<8x32xf32>
    %c0_3 = arith.constant 0 : index
    %c0_4 = arith.constant 0 : index
    %4 = vector.load %arg3[%c0_3, %c0_4] : memref<1x32xf32, #tpu.memory_space<vmem>>, vector<1x32xf32>
    %5 = vector.broadcast %4 : vector<1x32xf32> to vector<8x32xf32>
    %6 = arith.addf %3, %5 : vector<8x32xf32>
    %7 = math.tanh %6 : vector<8x32xf32>
    %c0_5 = arith.constant 0 : index
    %c0_6 = arith.constant 0 : index
    %8 = vector.load %arg7[%c0_5, %c0_6] : memref<8x32xf32, #tpu.memory_space<vmem>>, vector<8x32xf32>
    tpu.vector_store %arg7[%c0_5, %c0_6], %7 {strides = array<i32>} : memref<8x32xf32, #tpu.memory_space<vmem>>, vector<8x32xf32>,
    %9 = arith.truncf %7 : vector<8x32xf32> to vector<8x32xbf16>
    %c0_7 = arith.constant 0 : index
    %c0_8 = arith.constant 0 : index
    %10 = vector.load %arg4[%c0_7, %c0_8] : memref<2x32xbf16, #tpu.memory_space<vmem>>, vector<2x32xbf16>
    %cst_9 = arith.constant dense<0.000000e+00> : vector<8x2xf32>
    %11 = tpu.matmul %9, %10, %cst_9 {dimension_numbers = #tpu.dot_dimension_numbers<[1], [1], [0], [0], [0, 0, 1, 0], [], []>} : vector<8x32xbf16>, vector<2x32xbf16>, vector<8x2xf32> -> vector<8x2xf32>
    %c0_10 = arith.constant 0 : index
    %c0_11 = arith.constant 0 : index
    %12 = vector.load %arg5[%c0_10, %c0_11] : memref<1x2xf32, #tpu.memory_space<vmem>>, vector<1x2xf32>
    %13 = vector.broadcast %12 : vector<1x2xf32> to vector<8x2xf32>
    %14 = arith.addf %11, %13 : vector<8x2xf32>
    %15 = math.tanh %14 : vector<8x2xf32>
    %c0_12 = arith.constant 0 : index
    %c0_13 = arith.constant 0 : index
    %16 = vector.load %arg6[%c0_12, %c0_13] : memref<8x2xf32, #tpu.memory_space<vmem>>, vector<8x2xf32>
    tpu.vector_store %arg6[%c0_12, %c0_13], %15 {strides = array<i32>} : memref<8x2xf32, #tpu.memory_space<vmem>>, vector<8x2xf32>,
    return
  }
  func.func @transform_0(%arg0: i32) -> (i32, i32) {
    %c0_i32 = arith.constant 0 : i32
    %c0_i32_0 = arith.constant 0 : i32
    return %arg0, %c0_i32 : i32, i32
  }
  func.func @transform_1(%arg0: i32) -> (i32, i32) {
    %c0_i32 = arith.constant 0 : i32
    %c0_i32_0 = arith.constant 0 : i32
    %c0_i32_1 = arith.constant 0 : i32
    return %c0_i32, %c0_i32_0 : i32, i32
  }
  func.func @transform_2(%arg0: i32) -> (i32, i32) {
    %c0_i32 = arith.constant 0 : i32
    %c0_i32_0 = arith.constant 0 : i32
    %c0_i32_1 = arith.constant 0 : i32
    return %c0_i32, %c0_i32_0 : i32, i32
  }
  func.func @transform_3(%arg0: i32) -> (i32, i32) {
    %c0_i32 = arith.constant 0 : i32
    %c0_i32_0 = arith.constant 0 : i32
    %c0_i32_1 = arith.constant 0 : i32
    return %c0_i32, %c0_i32_0 : i32, i32
  }
  func.func @transform_4(%arg0: i32) -> (i32, i32) {
    %c0_i32 = arith.constant 0 : i32
    %c0_i32_0 = arith.constant 0 : i32
    %c0_i32_1 = arith.constant 0 : i32
    return %c0_i32, %c0_i32_0 : i32, i32
  }
  func.func @transform_5(%arg0: i32) -> (i32, i32) {
    %c0_i32 = arith.constant 0 : i32
    %c0_i32_0 = arith.constant 0 : i32
    return %arg0, %c0_i32 : i32, i32
  }
  func.func @transform_6(%arg0: i32) -> (i32, i32) {
    %c0_i32 = arith.constant 0 : i32
    %c0_i32_0 = arith.constant 0 : i32
    return %arg0, %c0_i32 : i32, i32
  }
}

</mosaic_0001>

<bundles_post_ra>
// kernel: net_forward.1
= control target key start
LH: loop header
LB: loop body
LE: loop exit
PB: predicated region body
PF: predicated region fallthrough
CT: control target
= control target key end

     0   :  { %v234_v1 = vmov 0.0   ;;  %vm47_vm0 = vcmask 130048   ;;  %vm235_vm1 = vmmov 0   ;;  %s305_s0 = inlined_call_operand.vmem [shape: f32[8,16], index: 0, kind: input, shape index: {}]   ;;  %s306_s1 = inlined_call_operand.vmem [shape: bf16[32,16], index: 1, kind: input, shape index: {}]   ;;  %s307_s2 = inlined_call_operand.vmem [shape: f32[1,32], index: 2, kind: input, shape index: {}]   ;;  %s308_s3 = inlined_call_operand.vmem [shape: bf16[2,32], index: 3, kind: input, shape index: {}]   ;;  %s309_s4 = inlined_call_operand.vmem [shape: f32[1,2], index: 4, kind: input, shape index: {}]   ;;  %s310_s5 = inlined_call_operand.vmem [shape: f32[8,2], index: 5, kind: output, shape index: {0}]   ;;  %s311_s6 = inlined_call_operand.hbm [shape: f32[8,32], index: 6, kind: output, shape index: {1}]  }
   0x1   :  { %v204_v0 = vld [vmem:[%s306_s1] sm:$0xff]   ;;  %187 = vmatprep.subr.bf16.mxu0 %v234_v1  ;;  %195 = vmatprep.subr.bf16.mxu1 %v234_v1 }
   0x2   :  { %v52_v2 = vsel %vm47_vm0, %v204_v0, 0  ;;  %191 = vmatprep.mubr.msk.bf16.mxu0 %vm235_vm1, %v234_v1 }
   0x3   :  { %188 = vmatpush3.bf16.xpose.msra.mxu0 %v52_v2 }
   0x4   :  { %12 = vsyncpa [#allocation3], 0  ;;  %189 = vmatprep.subr.bf16.mxu0 %v234_v1  ;;  %v205_v3 = vld [vmem:[%s306_s1 + $0x8] sm:$0xff]   ;;  %197 = vmatprep.mubr.msk.bf16.mxu1 %vm235_vm1, %v234_v1  ;;  %v24_v5 = vld [vmem:[%s305_s0] sm:$0xff]  ;;  %vm98_vm2 = vcmask 261120   ;;  %s236_s0 = smov [#allocation2]  }
   0x5   :  { %v55_v4 = vsel %vm47_vm0, %v205_v3, 0  ;;  %v25_v6 = vpack.c.bf16 %v24_v5, %v24_v5  ;;  %v101_v7 = vld [vmem:[%s308_s3] sm:$0x1]  ;;  %s166_s1 = sshll.u32 %s236_s0, 4  ;;  %s167_s1 = int_to_ptr.vmem [resolvable:$true] %s166_s1 }
   0x6   :  { %v113_v8 = vsel %vm98_vm2, %v101_v7, 0  ;;  %v176_v9 = vld [vmem:[%s307_s2] ss:$0 sm:$0xff]  ;;  %s210_s3 = scalar_lea.vmem %s167_s1, 128  ;;  %p215_p1 = scmp.lt.s32.totalorder %s167_s1, %s167_s1 }
   0x7   :  { %196 = vmatpush3.bf16.xpose.msra.mxu1 %v113_v8  ;;  %p211_p0 = scmp.ne.s32.totalorder %s167_s1, %s210_s3  ;;  %p216_p2 = scmp.lt.s32.totalorder %s210_s3, %s210_s3 }
   0x9   :  { %p217_p3 = por %p216_p2, %p215_p1 }
   0xb   :  { %190 = vmatpush3.bf16.xpose.msra.mxu0 %v55_v4  ;;  %p218_p4 = pnand %p217_p3, %p211_p0 }
  0x12   :  { %192 = vmatmul.mubr.msk.bf16.vlgmr.msra.gmra.mrb[0].mxu0 %vm47_vm0, %v25_v6 }
  0xe5   :  { %v91_v10 = vpop.f32.mrb[0].mxu0 }
  0xe6   :  { %v92_v11 = vadd.f32 %v176_v9, %v91_v10  ;;  %v193_v12 = vpop.f32.mrb[1].mxu0 }
  0xe7   :  { %v94_v13 = vpop.f32.mrb[2].mxu0 }
  0xe8   :  { %206 = vtanh.f32 %v92_v11  ;;  %v194_v14 = vpop.f32.mrb[3].mxu0 }
  0xf2   :  { %v207_v15 = vpop.eup %206 }
  0xf3   :  { %99 = vst.msk [vmem:[#allocation2] sm:$0xff] %vm98_vm2, %v207_v15  ;;  %v100_v16 = vpack.c.bf16 %v207_v15, %v207_v15 }
  0xf5   :  { %198 = vmatmul.mubr.msk.bf16.vlgmr.msra.gmra.mrb[0].mxu1 %vm98_vm2, %v100_v16 }
  0xf6   :  { %221 = shalt.err (!%p218_p4)
}
  0xf7   :  { %s222_s8 = scalar_lea.hbm %s311_s6, 128 }
  0xf8   :  { %p223_p5 = scmp.ne.s32.totalorder %s311_s6, %s222_s8  ;;  %p226_p6 = scmp.lt.u32.totalorder %s222_s8, %s311_s6 }
  0xfa   :  { %p228_p7 = pnand %p226_p6, %p223_p5 }
  0xfc   :  { %231 = shalt.err (!%p228_p7)
}
  0xfd   :  { %169 = dma.vmem_to_hbm [thread:$0]  %s167_s1, 128, %s311_s6, [#allocation3]   ;;  %v180_v17 = vld [vmem:[%s309_s4] ss:$0 sm:$0xff]  ;;  %vm156_vm3 = vcmask 15360  }
 0x1c8   :  { %v149_v18 = vpop.f32.mrb[0].mxu1 }
 0x1c9   :  { %v150_v19 = vadd.f32 %v180_v17, %v149_v18  ;;  %v199_v20 = vpop.f32.mrb[1].mxu1 }
 0x1ca   :  { %v152_v21 = vpop.f32.mrb[2].mxu1 }
 0x1cb   :  { %208 = vtanh.f32 %v150_v19  ;;  %v200_v22 = vpop.f32.mrb[3].mxu1 }
 0x1d5   :  { %v209_v23 = vpop.eup %208 }
 0x1d6   :  { %157 = vst.msk [vmem:[%s310_s5] sm:$0xff] %vm156_vm3, %v209_v23 }
 0x1d7   :  { %232 = dma.done.wait [#allocation3], 128  }
 0x1d8   :  { %233 = vsyncadd [#allocation3], 4294967168 }
 0x1d9   :  { %175 = vsyncpa [#allocation3], 1 }

</bundles_post_ra>
